<compile_context>
chip_gen: v7x
topology: tpu7x:2x2x1
jax: 0.10.0
libtpu: 0.0.40
codegen_flags: <defaults>
</compile_context>

<pallas_src>
import functools

import jax
import jax.numpy as jnp
from jax.experimental import pallas as pl
from jax.experimental.pallas import tpu as pltpu

_LANE = 128      # lane width (last-dim granule)
_SUBLANE = 8     # sublane granule (second-to-last dim)


def _round_up(v, m):
    return -(-v // m) * m


def _mlp_kernel(x_ref, w1_ref, b1_ref, w2_ref, b2_ref, w3_ref, b3_ref, o_ref):
    # Three MXU matmuls (f32 accumulation) + f32 bias adds + ReLUs, all in VMEM.
    x = x_ref[...]
    h1 = jnp.dot(x, w1_ref[...], preferred_element_type=jnp.float32) + b1_ref[...]
    h1 = jnp.maximum(h1, 0.0)
    h2 = jnp.dot(h1.astype(w2_ref.dtype), w2_ref[...],
                 preferred_element_type=jnp.float32) + b2_ref[...]
    h2 = jnp.maximum(h2, 0.0)
    out = jnp.dot(h2.astype(w3_ref.dtype), w3_ref[...],
                  preferred_element_type=jnp.float32) + b3_ref[...]
    o_ref[...] = out.astype(o_ref.dtype)


@functools.partial(jax.jit, static_argnames=("block_b", "compute_dtype"))
def dqn1_forward(x, params, *, block_b=None, compute_dtype=jnp.float32):
    """DQN_1 forward pass (x: (batch, n_inputs) f32) via a fused Pallas kernel."""
    w1, b1, w2, b2, w3, b3 = params
    batch, n_in = x.shape
    h = w1.shape[1]          # 64
    n_out = w3.shape[1]      # 3

    # ---- batch tile selection -------------------------------------------
    if block_b is None:
        if batch <= 512:
            # serving path: 2 grid steps so both v7x TensorCores get work;
            # on single-TC v5e/v6e the extra step is negligible at this size.
            block_b = _round_up(max(batch // 2, 1), _SUBLANE)
        else:
            # 512 is a multiple of both the v5e (128) and v6e/v7x (256) MXU
            # granule; small enough to be far under every generation's VMEM.
            block_b = 512
    block_b = _round_up(block_b, _SUBLANE)
    padded_batch = _round_up(batch, block_b)
    if padded_batch != batch:
        x = jnp.pad(x, ((0, padded_batch - batch), (0, 0)))

    # ---- lane-dense output: pad n_out 3 -> 128 (zero columns), slice later
    n_out_p = _round_up(n_out, _LANE)
    w3p = jnp.pad(w3, ((0, 0), (0, n_out_p - n_out)))
    b3p = jnp.pad(b3, ((0, 0), (0, n_out_p - n_out)))

    # ---- dtype plan: matmul operands in compute_dtype (bf16 on v6e/v7x for
    # native MXU passes), biases / epilogue / accumulation in f32.
    cd = jnp.dtype(compute_dtype)
    xk = x.astype(cd)
    w1k, w2k, w3k = (w.astype(cd) for w in (w1, w2, w3p))
    b1k, b2k, b3k = (b.astype(jnp.float32) for b in (b1, b2, b3p))

    grid = (padded_batch // block_b,)
    # Weights/biases: constant block index -> resident in VMEM across the grid.
    # (Default double-buffering accepted; single-buffering only matters when
    # block_b is pushed toward the v7x 64 MiB VMEM limit, which h=64 never does.)
    full = lambda shape: pl.BlockSpec(shape, lambda i: (0, 0))

    out = pl.pallas_call(
        _mlp_kernel,
        out_shape=jax.ShapeDtypeStruct((padded_batch, n_out_p), jnp.float32),
        grid_spec=pltpu.PrefetchScalarGridSpec(
            num_scalar_prefetch=0,
            grid=grid,
            in_specs=[
                pl.BlockSpec((block_b, n_in), lambda i: (i, 0)),  # x tile
                full((n_in, h)), full((1, h)),                    # layer 1
                full((h, h)),    full((1, h)),                    # layer 2
                full((h, n_out_p)), full((1, n_out_p)),           # layer 3 (padded)
            ],
            out_specs=pl.BlockSpec((block_b, n_out_p), lambda i: (i, 0)),
        ),
        compiler_params=pltpu.CompilerParams(
            dimension_semantics=("parallel",),
        ),
    )(xk, w1k, b1k, w2k, b2k, w3k, b3k)

    return out[:batch, :n_out]


def init_params(key, n_inputs, hidden=64, n_out=3, dtype=jnp.float32):
    """Deterministic synthetic init (PyTorch-Linear-style uniform bounds)."""
    def linear(k, fan_in, fan_out):
        k_w, k_b = jax.random.split(k)
        bound = 1.0 / jnp.sqrt(fan_in)
        # stored as (in, out) so the kernel does x @ W
        w = jax.random.uniform(k_w, (fan_in, fan_out), dtype, -bound, bound)
        b = jax.random.uniform(k_b, (1, fan_out), dtype, -bound, bound)
        return w, b

    k1, k2, k3 = jax.random.split(key, 3)
    w1, b1 = linear(k1, n_inputs, hidden)
    w2, b2 = linear(k2, hidden, hidden)
    w3, b3 = linear(k3, hidden, n_out)
    return (w1, b1, w2, b2, w3, b3)


def reference_forward(x, params):
    w1, b1, w2, b2, w3, b3 = params
    h1 = jnp.maximum(x @ w1 + b1, 0.0)
    h2 = jnp.maximum(h1 @ w2 + b2, 0.0)
    return h2 @ w3 + b3


if __name__ == "__main__":
    key = jax.random.PRNGKey(0)
    k_x, k_p = jax.random.split(key)

    batch, n_inputs = 16, 32
    x = jax.random.normal(k_x, (batch, n_inputs), dtype=jnp.float32)
    params = init_params(k_p, n_inputs)
    ref = reference_forward(x, params)

    # f32 path (strict check), 2 grid steps of 8 rows.
    out = jax.block_until_ready(dqn1_forward(x, params))
    assert out.shape == (batch, 3), out.shape
    assert jnp.allclose(out, ref, atol=1e-5, rtol=1e-5), "f32 mismatch vs reference"

    # bf16 MXU-input path (v6e/v7x win); f32 accumulation -> loose tolerance.
    out_bf16 = jax.block_until_ready(
        dqn1_forward(x, params, compute_dtype=jnp.bfloat16))
    assert out_bf16.shape == (batch, 3), out_bf16.shape
    assert jnp.allclose(out_bf16, ref, atol=5e-2, rtol=5e-2), "bf16 mismatch"

    # ragged batch exercises the zero-padding path.
    x13 = x[:13]
    out13 = jax.block_until_ready(dqn1_forward(x13, params))
    assert out13.shape == (13, 3), out13.shape
    assert jnp.allclose(out13, ref[:13], atol=1e-5, rtol=1e-5), "padded-batch mismatch"

    # larger batch exercises the 512-row (128/256-aligned) tile path.
    x_big = jax.random.normal(k_x, (1024, n_inputs), dtype=jnp.float32)
    out_big = jax.block_until_ready(dqn1_forward(x_big, params))
    assert out_big.shape == (1024, 3), out_big.shape
    assert jnp.allclose(out_big, reference_forward(x_big, params),
                        atol=1e-5, rtol=1e-5), "big-batch mismatch"

    print("KERNEL_OK")
</pallas_src>

<mosaic_0001>
module attributes {stable_mosaic.version = 11 : i64} {
  func.func @_mlp_kernel(%arg0: i32, %arg1: memref<8x32xf32, #tpu.memory_space<vmem>>, %arg2: memref<32x64xf32, #tpu.memory_space<vmem>>, %arg3: memref<1x64xf32, #tpu.memory_space<vmem>>, %arg4: memref<64x64xf32, #tpu.memory_space<vmem>>, %arg5: memref<1x64xf32, #tpu.memory_space<vmem>>, %arg6: memref<64x128xf32, #tpu.memory_space<vmem>>, %arg7: memref<1x128xf32, #tpu.memory_space<vmem>>, %arg8: memref<8x128xf32, #tpu.memory_space<vmem>>) attributes {dimension_semantics = [#tpu.dimension_semantics<parallel>], iteration_bounds = array<i64: 2>, scalar_prefetch = 0 : i64, scratch_operands = 0 : i64, tpu.core_type = #tpu.core_type<tc>, window_params = [{transform_indices = @transform_0, window_bounds = array<i64: 8, 32>}, {pipeline_mode = #tpu.pipeline_mode<synchronous>, transform_indices = @transform_1, window_bounds = array<i64: 32, 64>}, {pipeline_mode = #tpu.pipeline_mode<synchronous>, transform_indices = @transform_2, window_bounds = array<i64: 1, 64>}, {pipeline_mode = #tpu.pipeline_mode<synchronous>, transform_indices = @transform_3, window_bounds = array<i64: 64, 64>}, {pipeline_mode = #tpu.pipeline_mode<synchronous>, transform_indices = @transform_4, window_bounds = array<i64: 1, 64>}, {pipeline_mode = #tpu.pipeline_mode<synchronous>, transform_indices = @transform_5, window_bounds = array<i64: 64, 128>}, {pipeline_mode = #tpu.pipeline_mode<synchronous>, transform_indices = @transform_6, window_bounds = array<i64: 1, 128>}, {transform_indices = @transform_7, window_bounds = array<i64: 8, 128>}]} {
    %c0 = arith.constant 0 : index
    %c0_0 = arith.constant 0 : index
    %0 = vector.load %arg1[%c0, %c0_0] : memref<8x32xf32, #tpu.memory_space<vmem>>, vector<8x32xf32>
    %c0_1 = arith.constant 0 : index
    %c0_2 = arith.constant 0 : index
    %1 = vector.load %arg2[%c0_1, %c0_2] : memref<32x64xf32, #tpu.memory_space<vmem>>, vector<32x64xf32>
    %cst = arith.constant dense<0.000000e+00> : vector<8x64xf32>
    %2 = tpu.matmul %0, %1, %cst {dimension_numbers = #tpu.dot_dimension_numbers<[1], [0], [0], [1], [0, 0, 1, 1], [], []>} : vector<8x32xf32>, vector<32x64xf32>, vector<8x64xf32> -> vector<8x64xf32>
    %c0_3 = arith.constant 0 : index
    %c0_4 = arith.constant 0 : index
    %3 = vector.load %arg3[%c0_3, %c0_4] : memref<1x64xf32, #tpu.memory_space<vmem>>, vector<1x64xf32>
    %4 = vector.broadcast %3 : vector<1x64xf32> to vector<8x64xf32>
    %5 = arith.addf %2, %4 : vector<8x64xf32>
    %cst_5 = arith.constant 0.000000e+00 : f32
    %6 = vector.broadcast %cst_5 : f32 to vector<8x64xf32>
    %7 = arith.maximumf %5, %6 : vector<8x64xf32>
    %c0_6 = arith.constant 0 : index
    %c0_7 = arith.constant 0 : index
    %8 = vector.load %arg4[%c0_6, %c0_7] : memref<64x64xf32, #tpu.memory_space<vmem>>, vector<64x64xf32>
    %cst_8 = arith.constant dense<0.000000e+00> : vector<8x64xf32>
    %9 = tpu.matmul %7, %8, %cst_8 {dimension_numbers = #tpu.dot_dimension_numbers<[1], [0], [0], [1], [0, 0, 1, 1], [], []>} : vector<8x64xf32>, vector<64x64xf32>, vector<8x64xf32> -> vector<8x64xf32>
    %c0_9 = arith.constant 0 : index
    %c0_10 = arith.constant 0 : index
    %10 = vector.load %arg5[%c0_9, %c0_10] : memref<1x64xf32, #tpu.memory_space<vmem>>, vector<1x64xf32>
    %11 = vector.broadcast %10 : vector<1x64xf32> to vector<8x64xf32>
    %12 = arith.addf %9, %11 : vector<8x64xf32>
    %cst_11 = arith.constant 0.000000e+00 : f32
    %13 = vector.broadcast %cst_11 : f32 to vector<8x64xf32>
    %14 = arith.maximumf %12, %13 : vector<8x64xf32>
    %c0_12 = arith.constant 0 : index
    %c0_13 = arith.constant 0 : index
    %15 = vector.load %arg6[%c0_12, %c0_13] : memref<64x128xf32, #tpu.memory_space<vmem>>, vector<64x128xf32>
    %cst_14 = arith.constant dense<0.000000e+00> : vector<8x128xf32>
    %16 = tpu.matmul %14, %15, %cst_14 {dimension_numbers = #tpu.dot_dimension_numbers<[1], [0], [0], [1], [0, 0, 1, 1], [], []>} : vector<8x64xf32>, vector<64x128xf32>, vector<8x128xf32> -> vector<8x128xf32>
    %c0_15 = arith.constant 0 : index
    %c0_16 = arith.constant 0 : index
    %17 = vector.load %arg7[%c0_15, %c0_16] : memref<1x128xf32, #tpu.memory_space<vmem>>, vector<1x128xf32>
    %18 = vector.broadcast %17 : vector<1x128xf32> to vector<8x128xf32>
    %19 = arith.addf %16, %18 : vector<8x128xf32>
    %c0_17 = arith.constant 0 : index
    %c0_18 = arith.constant 0 : index
    %20 = vector.load %arg8[%c0_17, %c0_18] : memref<8x128xf32, #tpu.memory_space<vmem>>, vector<8x128xf32>
    tpu.vector_store %arg8[%c0_17, %c0_18], %19 {strides = array<i32>} : memref<8x128xf32, #tpu.memory_space<vmem>>, vector<8x128xf32>,
    return
  }
  func.func @transform_0(%arg0: i32) -> (i32, i32) {
    %c0_i32 = arith.constant 0 : i32
    %c0_i32_0 = arith.constant 0 : i32
    return %arg0, %c0_i32 : i32, i32
  }
  func.func @transform_1(%arg0: i32) -> (i32, i32) {
    %c0_i32 = arith.constant 0 : i32
    %c0_i32_0 = arith.constant 0 : i32
    %c0_i32_1 = arith.constant 0 : i32
    return %c0_i32, %c0_i32_0 : i32, i32
  }
  func.func @transform_2(%arg0: i32) -> (i32, i32) {
    %c0_i32 = arith.constant 0 : i32
    %c0_i32_0 = arith.constant 0 : i32
    %c0_i32_1 = arith.constant 0 : i32
    return %c0_i32, %c0_i32_0 : i32, i32
  }
  func.func @transform_3(%arg0: i32) -> (i32, i32) {
    %c0_i32 = arith.constant 0 : i32
    %c0_i32_0 = arith.constant 0 : i32
    %c0_i32_1 = arith.constant 0 : i32
    return %c0_i32, %c0_i32_0 : i32, i32
  }
  func.func @transform_4(%arg0: i32) -> (i32, i32) {
    %c0_i32 = arith.constant 0 : i32
    %c0_i32_0 = arith.constant 0 : i32
    %c0_i32_1 = arith.constant 0 : i32
    return %c0_i32, %c0_i32_0 : i32, i32
  }
  func.func @transform_5(%arg0: i32) -> (i32, i32) {
    %c0_i32 = arith.constant 0 : i32
    %c0_i32_0 = arith.constant 0 : i32
    %c0_i32_1 = arith.constant 0 : i32
    return %c0_i32, %c0_i32_0 : i32, i32
  }
  func.func @transform_6(%arg0: i32) -> (i32, i32) {
    %c0_i32 = arith.constant 0 : i32
    %c0_i32_0 = arith.constant 0 : i32
    %c0_i32_1 = arith.constant 0 : i32
    return %c0_i32, %c0_i32_0 : i32, i32
  }
  func.func @transform_7(%arg0: i32) -> (i32, i32) {
    %c0_i32 = arith.constant 0 : i32
    %c0_i32_0 = arith.constant 0 : i32
    return %arg0, %c0_i32 : i32, i32
  }
}

</mosaic_0001>

<bundles_post_ra>
// kernel: dqn1_forward.1
= control target key start
LH: loop header
LB: loop body
LE: loop exit
PB: predicated region body
PF: predicated region fallthrough
CT: control target
= control target key end

     0   :  { %s772_s24 = smov 0   ;;  %s868_s0 = inlined_call_operand.vmem [shape: f32[16,32], index: 0, kind: input, shape index: {}]   ;;  %s869_s1 = inlined_call_operand.vmem [shape: f32[32,64], index: 1, kind: input, shape index: {}]   ;;  %s870_s2 = inlined_call_operand.vmem [shape: f32[1,64], index: 2, kind: input, shape index: {}]   ;;  %s871_s3 = inlined_call_operand.vmem [shape: f32[64,64], index: 3, kind: input, shape index: {}]   ;;  %s872_s4 = inlined_call_operand.vmem [shape: f32[1,64], index: 4, kind: input, shape index: {}]   ;;  %s873_s5 = inlined_call_operand.vmem [shape: f32[64,128], index: 5, kind: input, shape index: {}]   ;;  %s874_s6 = inlined_call_operand.vmem [shape: f32[1,128], index: 6, kind: input, shape index: {}]   ;;  %s875_s7 = inlined_call_operand.vmem [shape: f32[16,128], index: 7, kind: output, shape index: {}]  }
   0x1 LB: > { %s593_s25 = sadd.s32 4294967295, %s727_s24   ;;  %p597_p0 = scmp.ge.s32.totalorder %s727_s24, 1  ;;  %s727_s24 = sphi %s772_s24, %s17_s24  }
   0x2   : > { %p236_p1 = scmp.lt.s32.totalorder %s727_s24, 3 }
   0x4   : > { %p237_p2 = pnand %p597_p0, %p236_p1 }
   0x5   : > { %v275_v0 = vld [vmem:[%s869_s1] sm:$0xff] (!%p237_p2)  ;;  %v276_v1 = vld [vmem:[%s869_s1 + $0x8] sm:$0xff] (!%p237_p2)  ;;  %v277_v2 = vld [vmem:[%s869_s1 + $0x10] sm:$0xff] (!%p237_p2)  ;;  %v729_v3 = vmov (!%p237_p2), 0.0|0.0   ;;  %vm730_vm0 = vmmov (!%p237_p2), 0   ;;  %v731_v6 = vmov (!%p237_p2), 0.0  }
   0x6   : > { %240 = sbr.rel (%p237_p2) target bundleno = 664 (0x298), region = 48  ;;  %680 = vmatprep.subr.bf16.mxu0 (!%p237_p2), %v729_v3  ;;  %v681_v4 = vpack.c.bf16 (!%p237_p2), %v276_v1, %v275_v0  ;;  %v278_v5 = vld [vmem:[%s869_s1 + $0x18] sm:$0xff] (!%p237_p2)  ;;  %639 = vmatprep.mubr.msk.f32.mxu0 (!%p237_p2), %vm730_vm0, %v731_v6  ;;  %p266_p3 = scmp.lt.s32.totalorder (!%p237_p2), %s593_s25, 1  ;;  %v361_v7 = vld [vmem:[%s871_s3] sm:$0xff] (!%p237_p2)  ;;  %v362_v8 = vld [vmem:[%s871_s3 + $0x8] sm:$0xff] (!%p237_p2)  ;;  %vm286_vm1 = vcmask (!%p237_p2), 261120  }
   0x7   : > { %686 = vmatprep.subr.bf16.mxu1 (!%p237_p2), %v729_v3  ;;  %v687_v9 = vpack.c.bf16 (!%p237_p2), %v362_v8, %v361_v7  ;;  %v363_v10 = vld [vmem:[%s871_s3 + $0x10] sm:$0xff] (!%p237_p2)  ;;  %v364_v11 = vld [vmem:[%s871_s3 + $0x18] sm:$0xff] (!%p237_p2)  ;;  %658 = vmatprep.mubr.msk.f32.mxu1 (!%p237_p2), %vm730_vm0, %v731_v6  ;;  %v684_v12 = vpack.c.bf16 (!%p237_p2), %v278_v5, %v277_v2  ;;  %v365_v14 = vld [vmem:[%s871_s3 + $0x20] sm:$0xff] (!%p237_p2)  ;;  %vm376_vm2 = vcmask (!%p237_p2), 523264  }
   0x8   : > { %682 = vmatpush3.bf16.msra.mxu0 (!%p237_p2), %v681_v4  ;;  %v690_v13 = vpack.c.bf16 (!%p237_p2), %v364_v11, %v363_v10  ;;  %v366_v15 = vld [vmem:[%s871_s3 + $0x28] sm:$0xff] (!%p237_p2)  ;;  %v367_v18 = vld [vmem:[%s871_s3 + $0x30] sm:$0xff] (!%p237_p2)  ;;  %v368_v19 = vld [vmem:[%s871_s3 + $0x38] sm:$0xff] (!%p237_p2) }
   0x9   : > { %683 = vmatprep.subr.bf16.mxu0 (!%p237_p2), %v729_v3  ;;  %688 = vmatpush3.bf16.msra.mxu1 (!%p237_p2), %v687_v9  ;;  %v693_v17 = vpack.c.bf16 (!%p237_p2), %v366_v15, %v365_v14  ;;  %v696_v20 = vpack.c.bf16 (!%p237_p2), %v368_v19, %v367_v18  ;;  %v451_v21 = vld [vmem:[%s873_s5] sm:$0xff] (!%p237_p2)  ;;  %v452_v22 = vld [vmem:[%s873_s5 + $0x8] sm:$0xff] (!%p237_p2)  ;;  %v453_v23 = vld [vmem:[%s873_s5 + $0x10] sm:$0xff] (!%p237_p2) }
   0xa   : > { %689 = vmatprep.subr.bf16.mxu1 (!%p237_p2), %v729_v3  ;;  %v699_v24 = vpack.c.bf16 (!%p237_p2), %v452_v22, %v451_v21  ;;  %v454_v25 = vld [vmem:[%s873_s5 + $0x18] sm:$0xff] (!%p237_p2)  ;;  %v455_v27 = vld [vmem:[%s873_s5 + $0x20] sm:$0xff] (!%p237_p2)  ;;  %v456_v28 = vld [vmem:[%s873_s5 + $0x28] sm:$0xff] (!%p237_p2) }
   0xb   : > { %v702_v26 = vpack.c.bf16 (!%p237_p2), %v454_v25, %v453_v23  ;;  %v705_v29 = vpack.c.bf16 (!%p237_p2), %v456_v28, %v455_v27  ;;  %v600_v30 = vld [vmem:[%s870_s2] ss:$0 sm:$0xff] (!%p237_p2)  ;;  %v457_v35 = vld [vmem:[%s873_s5 + $0x30] sm:$0xff] (!%p237_p2)  ;;  %v458_v36 = vld [vmem:[%s873_s5 + $0x38] sm:$0xff] (!%p237_p2) }
   0xc   : > { %685 = vmatpush3.bf16.msra.mxu0 (!%p237_p2), %v684_v12  ;;  %v708_v37 = vpack.c.bf16 (!%p237_p2), %v458_v36, %v457_v35  ;;  %v602_v38 = vld [vmem:[%s872_s4] ss:$0 sm:$0xff] (!%p237_p2) }
   0xd   : > { %s877_s25 = smov (!%p266_p3, %s593_s25), 1  ;;  %691 = vmatpush3.bf16.msra.mxu1 %v690_v13  ;;  %698 = vmatprep.subr.bf16.mxu0 %v729_v3  ;;  %v604_v43 = vld [vmem:[%s874_s6] ss:$0 sm:$0xff] }
   0xe   : > { %s598_s19 = sshll.u32 %s877_s25, 3  ;;  %692 = vmatprep.subr.bf16.mxu1 %v729_v3 }
   0xf   : > { %s269_s28 = scalar_lea.vmem %s868_s0, %s598_s19  ;;  %s273_s14 = scalar_lea.vmem %s875_s7, %s598_s19 }
  0x10   : > { %v274_v16 = vld [vmem:[%s269_s28] sm:$0xff] }
  0x11   : > { %640 = vmatmul.mubr.msk.f32.vlgmr.msra.gmra.mrb[0].mxu0 %vm286_vm1, %v274_v16  ;;  %694 = vmatpush3.bf16.msra.mxu1 %v693_v17 }
  0x12   : > { %677 = vmatprep.mubr.msk.f32.mxu0 %vm730_vm0, %v731_v6  ;;  %695 = vmatprep.subr.bf16.mxu1 %v729_v3 }
  0x13   : > { %700 = vmatpush3.bf16.msra.mxu0 %v699_v24 }
  0x14   : > { %701 = vmatprep.subr.bf16.mxu0 %v729_v3 }
  0x15   : > { %697 = vmatpush3.bf16.msra.mxu1 %v696_v20 }
  0x17   : > { %703 = vmatpush3.bf16.msra.mxu0 %v702_v26 }
  0x18   : > { %704 = vmatprep.subr.bf16.mxu0 %v729_v3 }
  0x1b   : > { %706 = vmatpush3.bf16.msra.mxu0 %v705_v29 }
  0x1c   : > { %707 = vmatprep.subr.bf16.mxu0 %v729_v3 }
  0x1f   : > { %709 = vmatpush3.bf16.msra.mxu0 %v708_v37 }
  0xe4   : > { %v356_v31 = vpop.f32.mrb[0].mxu0 }
  0xe5   : > { %v357_v32 = vadd.f32 %v600_v30, %v356_v31  ;;  %v641_v33 = vpop.f32.mrb[1].mxu0 }
  0xe7   : > { %v360_v34 = vmax.f32 %v357_v32, 0.0 }
  0xe9   : > { %659 = vmatmul.mubr.msk.f32.vlgmr.msra.gmra.mrb[0].mxu1 %vm376_vm2, %v360_v34 }
 0x1bc   : > { %v446_v39 = vpop.f32.mrb[0].mxu1 }
 0x1bd   : > { %v447_v40 = vadd.f32 %v602_v38, %v446_v39  ;;  %v660_v41 = vpop.f32.mrb[1].mxu1 }
 0x1bf   : > { %v450_v42 = vmax.f32 %v447_v40, 0.0 }
 0x1c1   : > { %678 = vmatmul.mubr.msk.f32.vlgmr.msra.gmra.mrb[2].mxu0 %vm376_vm2, %v450_v42 }
 0x294   : > { %v535_v44 = vpop.f32.mrb[2].mxu0 }
 0x295   : > { %v536_v45 = vadd.f32 %v604_v43, %v535_v44  ;;  %v679_v46 = vpop.f32.mrb[3].mxu0 }
 0x297   : > { %539 = vst [vmem:[%s273_s14] sm:$0xff] %v536_v45 }
 0x298 PF: > { %s17_s24 = sadd.s32 1, %s727_s24  }
 0x299   : > { %p14_p4 = scmp.ge.s32.totalorder %s17_s24, 4  }
 0x29b   :  { %16 = sbr.rel (!%p14_p4) target bundleno = 1 (0x1), region = 78 }

</bundles_post_ra>
